<compile_context>
chip_gen: v7x
topology: tpu7x:2x2x1
jax: 0.10.0
libtpu: 0.0.40
codegen_flags: <defaults>
</compile_context>

<pallas_src>
import functools

import jax
import jax.numpy as jnp
from jax.experimental import pallas as pl
from jax.experimental.pallas import tpu as pltpu


def cnn_kernel(words_ref,   # (padded_B*T,) int32 — scalar prefetch, SMEM
               tbl_ref,     # (V, E) f32   — whole embedding table, VMEM resident
               w_all_ref,   # (E, 12F) bf16 — all conv taps packed along cols
               bc_ref,      # (1, 3F) f32  — conv biases [b3 | b4 | b5]
               wp_ref,      # (3F, ntags) bf16
               bp_ref,      # (1, ntags) f32
               out_ref,     # (1, B_TILE, ntags) f32 block for this grid step
               emb_vmem,    # (B_TILE*T, E) f32 scratch
               *, b_tile, seq_len, num_filters):
    step = pl.program_id(0)
    T, F = seq_len, num_filters
    rows = b_tile * T
    base = step * rows

    # ---- embedding gather straight out of the VMEM-resident table ----------
    # One dynamic-row load + static-row store per token; no HBM DMAs at all.
    # `rows` is small and static, so the Python loop fully unrolls.
    for r in range(rows):
        idx = words_ref[base + r]
        emb_vmem[pl.ds(r, 1), :] = tbl_ref[pl.ds(idx, 1), :]

    # ---- one wide MXU pass over all 3+4+5 = 12 taps for the whole tile -----
    emb = emb_vmem[...].astype(w_all_ref.dtype)                  # (rows, E) bf16
    y = jnp.dot(emb, w_all_ref[...],
                preferred_element_type=jnp.float32)              # (rows, 12F) f32
    y = y.reshape(b_tile, T, 12 * F)

    # branch k (column base `col0`): conv[b, t] = sum_j y[b, t+j, col0+j*F : +F]
    # NOTE(prod): with large F, pad each tap's columns to a 128-lane multiple
    # (or realize the time shift with pltpu.roll) so these slices are whole vregs.
    def branch(k, col0):
        L = T - k + 1
        acc = y[:, 0:L, col0:col0 + F]                           # tap 0 (no zero init)
        for j in range(1, k):
            acc = acc + y[:, j:j + L, col0 + j * F:col0 + (j + 1) * F]
        return jnp.max(acc, axis=1)                              # (b_tile, F) max over time

    h = jnp.concatenate([branch(3, 0), branch(4, 3 * F), branch(5, 7 * F)],
                        axis=1)                                  # (b_tile, 3F)
    # bias after max (commutes with max) + ReLU, all f32 on the VPU
    h = jnp.maximum(h + bc_ref[...], 0.0)

    # single fused projection dot
    out = (jnp.dot(h.astype(wp_ref.dtype), wp_ref[...],
                   preferred_element_type=jnp.float32)
           + bp_ref[...])                                        # (b_tile, ntags)
    out_ref[0] = out.astype(out_ref.dtype)


def _choose_b_tile(batch, seq_len, target_rows=256):
    """B_TILE so B_TILE*T ~ target MXU M rows, while keeping >= 2 grid steps."""
    bt = max(1, -(-target_rows // seq_len))      # cdiv(target_rows, T)
    bt = min(bt, batch)
    if batch >= 2:
        bt = min(bt, max(1, batch // 2))         # grid >= 2 -> both v7x TCs busy
    return bt


def cnn_forward(words, packed, b_tile=None):
    B, T = words.shape
    assert T >= 5, "sequence must be at least as long as the widest conv (k=5)"
    V, E = packed["embedding"].shape
    F12 = packed["w_all"].shape[1]
    F = F12 // 12
    ntags = packed["proj_b"].shape[1]

    if b_tile is None:
        b_tile = _choose_b_tile(B, T)
    num_steps = -(-B // b_tile)
    padded_B = num_steps * b_tile

    # clamp ids (guards the in-kernel dynamic row load) and pad the batch
    words = jnp.clip(words.astype(jnp.int32), 0, V - 1)
    if padded_B != B:
        words = jnp.pad(words, ((0, padded_B - B), (0, 0)))
    words_flat = words.reshape(-1)               # 1-D -> minimal SMEM padding

    kernel = functools.partial(cnn_kernel, b_tile=b_tile, seq_len=T,
                               num_filters=F)

    grid_spec = pltpu.PrefetchScalarGridSpec(
        num_scalar_prefetch=1,                   # flattened `words` -> SMEM
        grid=(num_steps,),
        in_specs=[
            # Constant index_map => the pipeline DMAs each of these exactly once
            # and they stay resident in VMEM for the whole grid.
            # NOTE(prod, v7x): add pipeline_mode=pl.Buffered(1) here at
            # multi-MiB weight sizes to avoid pointless double-buffering.
            pl.BlockSpec((V, E), lambda s, w: (0, 0)),            # embedding table
            pl.BlockSpec((E, F12), lambda s, w: (0, 0)),          # packed conv weights
            pl.BlockSpec((1, 3 * F), lambda s, w: (0, 0)),        # packed conv biases
            pl.BlockSpec((3 * F, ntags), lambda s, w: (0, 0)),    # proj weight
            pl.BlockSpec((1, ntags), lambda s, w: (0, 0)),        # proj bias
        ],
        out_specs=pl.BlockSpec((1, b_tile, ntags), lambda s, w: (s, 0, 0)),
        scratch_shapes=[
            pltpu.VMEM((b_tile * T, E), jnp.float32),             # gathered rows
        ],
    )
    out = pl.pallas_call(
        kernel,
        out_shape=jax.ShapeDtypeStruct((num_steps, b_tile, ntags), jnp.float32),
        grid_spec=grid_spec,
        compiler_params=pltpu.CompilerParams(
            dimension_semantics=("parallel",)),   # batch steps -> both TCs on v7x
    )(words_flat, packed["embedding"], packed["w_all"], packed["conv_b"],
      packed["proj_w"], packed["proj_b"])
    return out.reshape(padded_B, ntags)[:B]       # (B, ntags)


def pack_params(params, compute_dtype=jnp.bfloat16):
    """Pack per-conv weights into kernel layout; MXU weight operands -> bf16."""
    taps = []
    for k in (3, 4, 5):
        w = params[f"w{k}"]                       # (k, E, F)
        taps.extend([w[j] for j in range(k)])
    w_all = jnp.concatenate(taps, axis=1).astype(compute_dtype)          # (E, 12F)
    conv_b = jnp.concatenate(
        [params["b3"], params["b4"], params["b5"]], axis=1).astype(jnp.float32)  # (1, 3F)
    return {
        # table stays f32: it is DMA'd into VMEM once and read via dynamic
        # single-row loads, which we keep in native 32-bit layout.
        "embedding": params["embedding"].astype(jnp.float32),            # (V, E)
        "w_all": w_all,
        "conv_b": conv_b,
        "proj_w": params["proj_w"].astype(compute_dtype),                # (3F, ntags)
        "proj_b": params["proj_b"].astype(jnp.float32),                  # (1, ntags)
    }


def ref_forward(words, params, matmul_dtype=jnp.float32):
    """Pure-JAX reference. matmul_dtype=bf16 mirrors the kernel's MXU casts."""
    def mx(x):
        return x.astype(matmul_dtype).astype(jnp.float32)

    emb = mx(params["embedding"][words])          # (B, T, E)
    B, T, E = emb.shape

    def conv_max(w, b):
        k, _, F = w.shape
        L = T - k + 1
        acc = jnp.zeros((B, L, F), jnp.float32)
        for j in range(k):
            acc = acc + jnp.einsum("ble,ef->blf", emb[:, j:j + L, :], mx(w[j]))
        return acc.max(axis=1) + b[0][None, :]

    h = jnp.concatenate([conv_max(params["w3"], params["b3"]),
                         conv_max(params["w4"], params["b4"]),
                         conv_max(params["w5"], params["b5"])], axis=1)
    h = jnp.maximum(h, 0.0)
    return mx(h) @ mx(params["proj_w"]) + params["proj_b"][0]


def init_params(key, vocab, embed_size, num_filters, ntags):
    ks = jax.random.split(key, 9)

    def u(k, shape, lim):
        return jax.random.uniform(k, shape, jnp.float32, -lim, lim)

    # embedding: uniform_(-0.25, 0.25) as in the module
    params = {"embedding": u(ks[0], (vocab, embed_size), 0.25)}
    # conv weights (k, E, F) + biases (1, F)
    for i, k_sz in enumerate((3, 4, 5)):
        lim = 1.0 / (embed_size * k_sz) ** 0.5
        params[f"w{k_sz}"] = u(ks[1 + 2 * i], (k_sz, embed_size, num_filters), lim)
        params[f"b{k_sz}"] = u(ks[2 + 2 * i], (1, num_filters), lim)
    # projection: xavier-uniform weight (3F, ntags), bias (1, ntags)
    fan_in, fan_out = 3 * num_filters, ntags
    xlim = (6.0 / (fan_in + fan_out)) ** 0.5
    params["proj_w"] = u(ks[7], (fan_in, fan_out), xlim)
    params["proj_b"] = u(ks[8], (1, ntags), 1.0 / fan_in ** 0.5)
    return params


if __name__ == "__main__":
    # small deterministic shapes: batch=2, seq=16, embed=32, filters=8, tags=5
    VOCAB, EMBED, FILTERS, NTAGS = 50, 32, 8, 5
    B, T = 2, 16

    key = jax.random.PRNGKey(0)
    k_par, k_words = jax.random.split(key)
    params = init_params(k_par, VOCAB, EMBED, FILTERS, NTAGS)
    packed = pack_params(params)
    words = jax.random.randint(k_words, (B, T), 0, VOCAB, dtype=jnp.int32)

    out = jax.block_until_ready(cnn_forward(words, packed))
    assert out.shape == (B, NTAGS)

    # tight check vs. a reference that mirrors the kernel's bf16 MXU casts
    ref_bf16 = jax.block_until_ready(ref_forward(words, params, jnp.bfloat16))
    assert jnp.allclose(out, ref_bf16, atol=5e-3, rtol=5e-3), (out, ref_bf16)
    # loose sanity check vs. the pure-f32 original-module math
    ref_f32 = jax.block_until_ready(ref_forward(words, params, jnp.float32))
    assert jnp.allclose(out, ref_f32, atol=5e-2, rtol=5e-2), (out, ref_f32)

    print("KERNEL_OK")
</pallas_src>

<mosaic_0001>
module attributes {stable_mosaic.version = 11 : i64} {
  func.func @cnn_kernel(%arg0: i32, %arg1: memref<32xi32, #tpu.memory_space<smem>>, %arg2: memref<50x32xf32, #tpu.memory_space<vmem>>, %arg3: memref<32x96xbf16, #tpu.memory_space<vmem>>, %arg4: memref<1x24xf32, #tpu.memory_space<vmem>>, %arg5: memref<24x5xbf16, #tpu.memory_space<vmem>>, %arg6: memref<1x5xf32, #tpu.memory_space<vmem>>, %arg7: memref<1x1x5xf32, #tpu.memory_space<vmem>>, %arg8: memref<16x32xf32, #tpu.memory_space<vmem>>) attributes {dimension_semantics = [#tpu.dimension_semantics<parallel>], iteration_bounds = array<i64: 2>, scalar_prefetch = 1 : i64, scratch_operands = 1 : i64, tpu.core_type = #tpu.core_type<tc>, window_params = [{pipeline_mode = #tpu.pipeline_mode<synchronous>, transform_indices = @transform_0, window_bounds = array<i64: 50, 32>}, {pipeline_mode = #tpu.pipeline_mode<synchronous>, transform_indices = @transform_1, window_bounds = array<i64: 32, 96>}, {pipeline_mode = #tpu.pipeline_mode<synchronous>, transform_indices = @transform_2, window_bounds = array<i64: 1, 24>}, {pipeline_mode = #tpu.pipeline_mode<synchronous>, transform_indices = @transform_3, window_bounds = array<i64: 24, 5>}, {pipeline_mode = #tpu.pipeline_mode<synchronous>, transform_indices = @transform_4, window_bounds = array<i64: 1, 5>}, {transform_indices = @transform_5, window_bounds = array<i64: 1, 1, 5>}]} {
    %c16_i32 = arith.constant 16 : i32
    %0 = arith.muli %arg0, %c16_i32 : i32
    %c0_i32 = arith.constant 0 : i32
    %1 = arith.addi %0, %c0_i32 : i32
    %2 = arith.index_cast %1 : i32 to index
    %3 = memref.load %arg1[%2] : memref<32xi32, #tpu.memory_space<smem>>
    %4 = arith.index_cast %3 : i32 to index
    %c0 = arith.constant 0 : index
    %5 = vector.load %arg2[%4, %c0] : memref<50x32xf32, #tpu.memory_space<vmem>>, vector<1x32xf32>
    %c0_0 = arith.constant 0 : index
    %c0_1 = arith.constant 0 : index
    %6 = vector.load %arg8[%c0_0, %c0_1] : memref<16x32xf32, #tpu.memory_space<vmem>>, vector<1x32xf32>
    tpu.vector_store %arg8[%c0_0, %c0_1], %5 {strides = array<i32>} : memref<16x32xf32, #tpu.memory_space<vmem>>, vector<1x32xf32>,
    %c1_i32 = arith.constant 1 : i32
    %7 = arith.addi %0, %c1_i32 : i32
    %8 = arith.index_cast %7 : i32 to index
    %9 = memref.load %arg1[%8] : memref<32xi32, #tpu.memory_space<smem>>
    %10 = arith.index_cast %9 : i32 to index
    %c0_2 = arith.constant 0 : index
    %11 = vector.load %arg2[%10, %c0_2] : memref<50x32xf32, #tpu.memory_space<vmem>>, vector<1x32xf32>
    %c1 = arith.constant 1 : index
    %c0_3 = arith.constant 0 : index
    %12 = vector.load %arg8[%c1, %c0_3] : memref<16x32xf32, #tpu.memory_space<vmem>>, vector<1x32xf32>
    tpu.vector_store %arg8[%c1, %c0_3], %11 {strides = array<i32>} : memref<16x32xf32, #tpu.memory_space<vmem>>, vector<1x32xf32>,
    %c2_i32 = arith.constant 2 : i32
    %13 = arith.addi %0, %c2_i32 : i32
    %14 = arith.index_cast %13 : i32 to index
    %15 = memref.load %arg1[%14] : memref<32xi32, #tpu.memory_space<smem>>
    %16 = arith.index_cast %15 : i32 to index
    %c0_4 = arith.constant 0 : index
    %17 = vector.load %arg2[%16, %c0_4] : memref<50x32xf32, #tpu.memory_space<vmem>>, vector<1x32xf32>
    %c2 = arith.constant 2 : index
    %c0_5 = arith.constant 0 : index
    %18 = vector.load %arg8[%c2, %c0_5] : memref<16x32xf32, #tpu.memory_space<vmem>>, vector<1x32xf32>
    tpu.vector_store %arg8[%c2, %c0_5], %17 {strides = array<i32>} : memref<16x32xf32, #tpu.memory_space<vmem>>, vector<1x32xf32>,
    %c3_i32 = arith.constant 3 : i32
    %19 = arith.addi %0, %c3_i32 : i32
    %20 = arith.index_cast %19 : i32 to index
    %21 = memref.load %arg1[%20] : memref<32xi32, #tpu.memory_space<smem>>
    %22 = arith.index_cast %21 : i32 to index
    %c0_6 = arith.constant 0 : index
    %23 = vector.load %arg2[%22, %c0_6] : memref<50x32xf32, #tpu.memory_space<vmem>>, vector<1x32xf32>
    %c3 = arith.constant 3 : index
    %c0_7 = arith.constant 0 : index
    %24 = vector.load %arg8[%c3, %c0_7] : memref<16x32xf32, #tpu.memory_space<vmem>>, vector<1x32xf32>
    tpu.vector_store %arg8[%c3, %c0_7], %23 {strides = array<i32>} : memref<16x32xf32, #tpu.memory_space<vmem>>, vector<1x32xf32>,
    %c4_i32 = arith.constant 4 : i32
    %25 = arith.addi %0, %c4_i32 : i32
    %26 = arith.index_cast %25 : i32 to index
    %27 = memref.load %arg1[%26] : memref<32xi32, #tpu.memory_space<smem>>
    %28 = arith.index_cast %27 : i32 to index
    %c0_8 = arith.constant 0 : index
    %29 = vector.load %arg2[%28, %c0_8] : memref<50x32xf32, #tpu.memory_space<vmem>>, vector<1x32xf32>
    %c4 = arith.constant 4 : index
    %c0_9 = arith.constant 0 : index
    %30 = vector.load %arg8[%c4, %c0_9] : memref<16x32xf32, #tpu.memory_space<vmem>>, vector<1x32xf32>
    tpu.vector_store %arg8[%c4, %c0_9], %29 {strides = array<i32>} : memref<16x32xf32, #tpu.memory_space<vmem>>, vector<1x32xf32>,
    %c5_i32 = arith.constant 5 : i32
    %31 = arith.addi %0, %c5_i32 : i32
    %32 = arith.index_cast %31 : i32 to index
    %33 = memref.load %arg1[%32] : memref<32xi32, #tpu.memory_space<smem>>
    %34 = arith.index_cast %33 : i32 to index
    %c0_10 = arith.constant 0 : index
    %35 = vector.load %arg2[%34, %c0_10] : memref<50x32xf32, #tpu.memory_space<vmem>>, vector<1x32xf32>
    %c5 = arith.constant 5 : index
    %c0_11 = arith.constant 0 : index
    %36 = vector.load %arg8[%c5, %c0_11] : memref<16x32xf32, #tpu.memory_space<vmem>>, vector<1x32xf32>
    tpu.vector_store %arg8[%c5, %c0_11], %35 {strides = array<i32>} : memref<16x32xf32, #tpu.memory_space<vmem>>, vector<1x32xf32>,
    %c6_i32 = arith.constant 6 : i32
    %37 = arith.addi %0, %c6_i32 : i32
    %38 = arith.index_cast %37 : i32 to index
    %39 = memref.load %arg1[%38] : memref<32xi32, #tpu.memory_space<smem>>
    %40 = arith.index_cast %39 : i32 to index
    %c0_12 = arith.constant 0 : index
    %41 = vector.load %arg2[%40, %c0_12] : memref<50x32xf32, #tpu.memory_space<vmem>>, vector<1x32xf32>
    %c6 = arith.constant 6 : index
    %c0_13 = arith.constant 0 : index
    %42 = vector.load %arg8[%c6, %c0_13] : memref<16x32xf32, #tpu.memory_space<vmem>>, vector<1x32xf32>
    tpu.vector_store %arg8[%c6, %c0_13], %41 {strides = array<i32>} : memref<16x32xf32, #tpu.memory_space<vmem>>, vector<1x32xf32>,
    %c7_i32 = arith.constant 7 : i32
    %43 = arith.addi %0, %c7_i32 : i32
    %44 = arith.index_cast %43 : i32 to index
    %45 = memref.load %arg1[%44] : memref<32xi32, #tpu.memory_space<smem>>
    %46 = arith.index_cast %45 : i32 to index
    %c0_14 = arith.constant 0 : index
    %47 = vector.load %arg2[%46, %c0_14] : memref<50x32xf32, #tpu.memory_space<vmem>>, vector<1x32xf32>
    %c7 = arith.constant 7 : index
    %c0_15 = arith.constant 0 : index
    %48 = vector.load %arg8[%c7, %c0_15] : memref<16x32xf32, #tpu.memory_space<vmem>>, vector<1x32xf32>
    tpu.vector_store %arg8[%c7, %c0_15], %47 {strides = array<i32>} : memref<16x32xf32, #tpu.memory_space<vmem>>, vector<1x32xf32>,
    %c8_i32 = arith.constant 8 : i32
    %49 = arith.addi %0, %c8_i32 : i32
    %50 = arith.index_cast %49 : i32 to index
    %51 = memref.load %arg1[%50] : memref<32xi32, #tpu.memory_space<smem>>
    %52 = arith.index_cast %51 : i32 to index
    %c0_16 = arith.constant 0 : index
    %53 = vector.load %arg2[%52, %c0_16] : memref<50x32xf32, #tpu.memory_space<vmem>>, vector<1x32xf32>
    %c8 = arith.constant 8 : index
    %c0_17 = arith.constant 0 : index
    %54 = vector.load %arg8[%c8, %c0_17] : memref<16x32xf32, #tpu.memory_space<vmem>>, vector<1x32xf32>
    tpu.vector_store %arg8[%c8, %c0_17], %53 {strides = array<i32>} : memref<16x32xf32, #tpu.memory_space<vmem>>, vector<1x32xf32>,
    %c9_i32 = arith.constant 9 : i32
    %55 = arith.addi %0, %c9_i32 : i32
    %56 = arith.index_cast %55 : i32 to index
    %57 = memref.load %arg1[%56] : memref<32xi32, #tpu.memory_space<smem>>
    %58 = arith.index_cast %57 : i32 to index
    %c0_18 = arith.constant 0 : index
    %59 = vector.load %arg2[%58, %c0_18] : memref<50x32xf32, #tpu.memory_space<vmem>>, vector<1x32xf32>
    %c9 = arith.constant 9 : index
    %c0_19 = arith.constant 0 : index
    %60 = vector.load %arg8[%c9, %c0_19] : memref<16x32xf32, #tpu.memory_space<vmem>>, vector<1x32xf32>
    tpu.vector_store %arg8[%c9, %c0_19], %59 {strides = array<i32>} : memref<16x32xf32, #tpu.memory_space<vmem>>, vector<1x32xf32>,
    %c10_i32 = arith.constant 10 : i32
    %61 = arith.addi %0, %c10_i32 : i32
    %62 = arith.index_cast %61 : i32 to index
    %63 = memref.load %arg1[%62] : memref<32xi32, #tpu.memory_space<smem>>
    %64 = arith.index_cast %63 : i32 to index
    %c0_20 = arith.constant 0 : index
    %65 = vector.load %arg2[%64, %c0_20] : memref<50x32xf32, #tpu.memory_space<vmem>>, vector<1x32xf32>
    %c10 = arith.constant 10 : index
    %c0_21 = arith.constant 0 : index
    %66 = vector.load %arg8[%c10, %c0_21] : memref<16x32xf32, #tpu.memory_space<vmem>>, vector<1x32xf32>
    tpu.vector_store %arg8[%c10, %c0_21], %65 {strides = array<i32>} : memref<16x32xf32, #tpu.memory_space<vmem>>, vector<1x32xf32>,
    %c11_i32 = arith.constant 11 : i32
    %67 = arith.addi %0, %c11_i32 : i32
    %68 = arith.index_cast %67 : i32 to index
    %69 = memref.load %arg1[%68] : memref<32xi32, #tpu.memory_space<smem>>
    %70 = arith.index_cast %69 : i32 to index
    %c0_22 = arith.constant 0 : index
    %71 = vector.load %arg2[%70, %c0_22] : memref<50x32xf32, #tpu.memory_space<vmem>>, vector<1x32xf32>
    %c11 = arith.constant 11 : index
    %c0_23 = arith.constant 0 : index
    %72 = vector.load %arg8[%c11, %c0_23] : memref<16x32xf32, #tpu.memory_space<vmem>>, vector<1x32xf32>
    tpu.vector_store %arg8[%c11, %c0_23], %71 {strides = array<i32>} : memref<16x32xf32, #tpu.memory_space<vmem>>, vector<1x32xf32>,
    %c12_i32 = arith.constant 12 : i32
    %73 = arith.addi %0, %c12_i32 : i32
    %74 = arith.index_cast %73 : i32 to index
    %75 = memref.load %arg1[%74] : memref<32xi32, #tpu.memory_space<smem>>
    %76 = arith.index_cast %75 : i32 to index
    %c0_24 = arith.constant 0 : index
    %77 = vector.load %arg2[%76, %c0_24] : memref<50x32xf32, #tpu.memory_space<vmem>>, vector<1x32xf32>
    %c12 = arith.constant 12 : index
    %c0_25 = arith.constant 0 : index
    %78 = vector.load %arg8[%c12, %c0_25] : memref<16x32xf32, #tpu.memory_space<vmem>>, vector<1x32xf32>
    tpu.vector_store %arg8[%c12, %c0_25], %77 {strides = array<i32>} : memref<16x32xf32, #tpu.memory_space<vmem>>, vector<1x32xf32>,
    %c13_i32 = arith.constant 13 : i32
    %79 = arith.addi %0, %c13_i32 : i32
    %80 = arith.index_cast %79 : i32 to index
    %81 = memref.load %arg1[%80] : memref<32xi32, #tpu.memory_space<smem>>
    %82 = arith.index_cast %81 : i32 to index
    %c0_26 = arith.constant 0 : index
    %83 = vector.load %arg2[%82, %c0_26] : memref<50x32xf32, #tpu.memory_space<vmem>>, vector<1x32xf32>
    %c13 = arith.constant 13 : index
    %c0_27 = arith.constant 0 : index
    %84 = vector.load %arg8[%c13, %c0_27] : memref<16x32xf32, #tpu.memory_space<vmem>>, vector<1x32xf32>
    tpu.vector_store %arg8[%c13, %c0_27], %83 {strides = array<i32>} : memref<16x32xf32, #tpu.memory_space<vmem>>, vector<1x32xf32>,
    %c14_i32 = arith.constant 14 : i32
    %85 = arith.addi %0, %c14_i32 : i32
    %86 = arith.index_cast %85 : i32 to index
    %87 = memref.load %arg1[%86] : memref<32xi32, #tpu.memory_space<smem>>
    %88 = arith.index_cast %87 : i32 to index
    %c0_28 = arith.constant 0 : index
    %89 = vector.load %arg2[%88, %c0_28] : memref<50x32xf32, #tpu.memory_space<vmem>>, vector<1x32xf32>
    %c14 = arith.constant 14 : index
    %c0_29 = arith.constant 0 : index
    %90 = vector.load %arg8[%c14, %c0_29] : memref<16x32xf32, #tpu.memory_space<vmem>>, vector<1x32xf32>
    tpu.vector_store %arg8[%c14, %c0_29], %89 {strides = array<i32>} : memref<16x32xf32, #tpu.memory_space<vmem>>, vector<1x32xf32>,
    %c15_i32 = arith.constant 15 : i32
    %91 = arith.addi %0, %c15_i32 : i32
    %92 = arith.index_cast %91 : i32 to index
    %93 = memref.load %arg1[%92] : memref<32xi32, #tpu.memory_space<smem>>
    %94 = arith.index_cast %93 : i32 to index
    %c0_30 = arith.constant 0 : index
    %95 = vector.load %arg2[%94, %c0_30] : memref<50x32xf32, #tpu.memory_space<vmem>>, vector<1x32xf32>
    %c15 = arith.constant 15 : index
    %c0_31 = arith.constant 0 : index
    %96 = vector.load %arg8[%c15, %c0_31] : memref<16x32xf32, #tpu.memory_space<vmem>>, vector<1x32xf32>
    tpu.vector_store %arg8[%c15, %c0_31], %95 {strides = array<i32>} : memref<16x32xf32, #tpu.memory_space<vmem>>, vector<1x32xf32>,
    %c0_32 = arith.constant 0 : index
    %c0_33 = arith.constant 0 : index
    %97 = vector.load %arg8[%c0_32, %c0_33] : memref<16x32xf32, #tpu.memory_space<vmem>>, vector<16x32xf32>
    %98 = arith.truncf %97 : vector<16x32xf32> to vector<16x32xbf16>
    %c0_34 = arith.constant 0 : index
    %c0_35 = arith.constant 0 : index
    %99 = vector.load %arg3[%c0_34, %c0_35] : memref<32x96xbf16, #tpu.memory_space<vmem>>, vector<32x96xbf16>
    %cst = arith.constant dense<0.000000e+00> : vector<16x96xf32>
    %100 = tpu.matmul %98, %99, %cst {dimension_numbers = #tpu.dot_dimension_numbers<[1], [0], [0], [1], [0, 0, 1, 1], [], []>} : vector<16x32xbf16>, vector<32x96xbf16>, vector<16x96xf32> -> vector<16x96xf32>
    %101 = vector.shape_cast %100 : vector<16x96xf32> to vector<1x16x96xf32>
    %102 = vector.extract_strided_slice %101 {offsets = [0, 0, 0], sizes = [1, 14, 8], strides = [1, 1, 1]} : vector<1x16x96xf32> to vector<1x14x8xf32>
    %103 = vector.extract_strided_slice %101 {offsets = [0, 1, 8], sizes = [1, 14, 8], strides = [1, 1, 1]} : vector<1x16x96xf32> to vector<1x14x8xf32>
    %104 = arith.addf %102, %103 : vector<1x14x8xf32>
    %105 = vector.extract_strided_slice %101 {offsets = [0, 2, 16], sizes = [1, 14, 8], strides = [1, 1, 1]} : vector<1x16x96xf32> to vector<1x14x8xf32>
    %106 = arith.addf %104, %105 : vector<1x14x8xf32>
    %cst_36 = arith.constant dense<0xFF800000> : vector<1x8xf32>
    %107 = vector.multi_reduction <maximumf>, %106, %cst_36 [1] : vector<1x14x8xf32> to vector<1x8xf32>
    %108 = vector.extract_strided_slice %101 {offsets = [0, 0, 24], sizes = [1, 13, 8], strides = [1, 1, 1]} : vector<1x16x96xf32> to vector<1x13x8xf32>
    %109 = vector.extract_strided_slice %101 {offsets = [0, 1, 32], sizes = [1, 13, 8], strides = [1, 1, 1]} : vector<1x16x96xf32> to vector<1x13x8xf32>
    %110 = arith.addf %108, %109 : vector<1x13x8xf32>
    %111 = vector.extract_strided_slice %101 {offsets = [0, 2, 40], sizes = [1, 13, 8], strides = [1, 1, 1]} : vector<1x16x96xf32> to vector<1x13x8xf32>
    %112 = arith.addf %110, %111 : vector<1x13x8xf32>
    %113 = vector.extract_strided_slice %101 {offsets = [0, 3, 48], sizes = [1, 13, 8], strides = [1, 1, 1]} : vector<1x16x96xf32> to vector<1x13x8xf32>
    %114 = arith.addf %112, %113 : vector<1x13x8xf32>
    %cst_37 = arith.constant dense<0xFF800000> : vector<1x8xf32>
    %115 = vector.multi_reduction <maximumf>, %114, %cst_37 [1] : vector<1x13x8xf32> to vector<1x8xf32>
    %116 = vector.extract_strided_slice %101 {offsets = [0, 0, 56], sizes = [1, 12, 8], strides = [1, 1, 1]} : vector<1x16x96xf32> to vector<1x12x8xf32>
    %117 = vector.extract_strided_slice %101 {offsets = [0, 1, 64], sizes = [1, 12, 8], strides = [1, 1, 1]} : vector<1x16x96xf32> to vector<1x12x8xf32>
    %118 = arith.addf %116, %117 : vector<1x12x8xf32>
    %119 = vector.extract_strided_slice %101 {offsets = [0, 2, 72], sizes = [1, 12, 8], strides = [1, 1, 1]} : vector<1x16x96xf32> to vector<1x12x8xf32>
    %120 = arith.addf %118, %119 : vector<1x12x8xf32>
    %121 = vector.extract_strided_slice %101 {offsets = [0, 3, 80], sizes = [1, 12, 8], strides = [1, 1, 1]} : vector<1x16x96xf32> to vector<1x12x8xf32>
    %122 = arith.addf %120, %121 : vector<1x12x8xf32>
    %123 = vector.extract_strided_slice %101 {offsets = [0, 4, 88], sizes = [1, 12, 8], strides = [1, 1, 1]} : vector<1x16x96xf32> to vector<1x12x8xf32>
    %124 = arith.addf %122, %123 : vector<1x12x8xf32>
    %cst_38 = arith.constant dense<0xFF800000> : vector<1x8xf32>
    %125 = vector.multi_reduction <maximumf>, %124, %cst_38 [1] : vector<1x12x8xf32> to vector<1x8xf32>
    %126 = tpu.concatenate %107, %115, %125 in 1 : vector<1x8xf32>, vector<1x8xf32>, vector<1x8xf32> -> vector<1x24xf32>
    %c0_39 = arith.constant 0 : index
    %c0_40 = arith.constant 0 : index
    %127 = vector.load %arg4[%c0_39, %c0_40] : memref<1x24xf32, #tpu.memory_space<vmem>>, vector<1x24xf32>
    %128 = arith.addf %126, %127 : vector<1x24xf32>
    %cst_41 = arith.constant 0.000000e+00 : f32
    %129 = vector.broadcast %cst_41 : f32 to vector<1x24xf32>
    %130 = arith.maximumf %128, %129 : vector<1x24xf32>
    %131 = arith.truncf %130 : vector<1x24xf32> to vector<1x24xbf16>
    %c0_42 = arith.constant 0 : index
    %c0_43 = arith.constant 0 : index
    %132 = vector.load %arg5[%c0_42, %c0_43] : memref<24x5xbf16, #tpu.memory_space<vmem>>, vector<24x5xbf16>
    %cst_44 = arith.constant dense<0.000000e+00> : vector<1x5xf32>
    %133 = tpu.matmul %131, %132, %cst_44 {dimension_numbers = #tpu.dot_dimension_numbers<[1], [0], [0], [1], [0, 0, 1, 1], [], []>} : vector<1x24xbf16>, vector<24x5xbf16>, vector<1x5xf32> -> vector<1x5xf32>
    %c0_45 = arith.constant 0 : index
    %c0_46 = arith.constant 0 : index
    %134 = vector.load %arg6[%c0_45, %c0_46] : memref<1x5xf32, #tpu.memory_space<vmem>>, vector<1x5xf32>
    %135 = arith.addf %133, %134 : vector<1x5xf32>
    %c0_47 = arith.constant 0 : index
    %c0_48 = arith.constant 0 : index
    %c0_49 = arith.constant 0 : index
    %136 = vector.load %arg7[%c0_47, %c0_48, %c0_49] : memref<1x1x5xf32, #tpu.memory_space<vmem>>, vector<1x1x5xf32>
    %137 = vector.shape_cast %136 : vector<1x1x5xf32> to vector<1x5xf32>
    %138 = vector.shape_cast %135 : vector<1x5xf32> to vector<1x1x5xf32>
    tpu.vector_store %arg7[%c0_47, %c0_48, %c0_49], %138 {strides = array<i32>} : memref<1x1x5xf32, #tpu.memory_space<vmem>>, vector<1x1x5xf32>,
    return
  }
  func.func @transform_0(%arg0: i32, %arg1: memref<32xi32, #tpu.memory_space<smem>>) -> (i32, i32) {
    %c0_i32 = arith.constant 0 : i32
    %c0_i32_0 = arith.constant 0 : i32
    %c0_i32_1 = arith.constant 0 : i32
    return %c0_i32, %c0_i32_0 : i32, i32
  }
  func.func @transform_1(%arg0: i32, %arg1: memref<32xi32, #tpu.memory_space<smem>>) -> (i32, i32) {
    %c0_i32 = arith.constant 0 : i32
    %c0_i32_0 = arith.constant 0 : i32
    %c0_i32_1 = arith.constant 0 : i32
    return %c0_i32, %c0_i32_0 : i32, i32
  }
  func.func @transform_2(%arg0: i32, %arg1: memref<32xi32, #tpu.memory_space<smem>>) -> (i32, i32) {
    %c0_i32 = arith.constant 0 : i32
    %c0_i32_0 = arith.constant 0 : i32
    %c0_i32_1 = arith.constant 0 : i32
    return %c0_i32, %c0_i32_0 : i32, i32
  }
  func.func @transform_3(%arg0: i32, %arg1: memref<32xi32, #tpu.memory_space<smem>>) -> (i32, i32) {
    %c0_i32 = arith.constant 0 : i32
    %c0_i32_0 = arith.constant 0 : i32
    %c0_i32_1 = arith.constant 0 : i32
    return %c0_i32, %c0_i32_0 : i32, i32
  }
  func.func @transform_4(%arg0: i32, %arg1: memref<32xi32, #tpu.memory_space<smem>>) -> (i32, i32) {
    %c0_i32 = arith.constant 0 : i32
    %c0_i32_0 = arith.constant 0 : i32
    %c0_i32_1 = arith.constant 0 : i32
    return %c0_i32, %c0_i32_0 : i32, i32
  }
  func.func @transform_5(%arg0: i32, %arg1: memref<32xi32, #tpu.memory_space<smem>>) -> (i32, i32, i32) {
    %c0_i32 = arith.constant 0 : i32
    %c0_i32_0 = arith.constant 0 : i32
    %c0_i32_1 = arith.constant 0 : i32
    return %arg0, %c0_i32, %c0_i32_0 : i32, i32, i32
  }
}

</mosaic_0001>

<bundles_post_ra>
// kernel: tpu_custom_call.1
= control target key start
LH: loop header
LB: loop body
LE: loop exit
PB: predicated region body
PF: predicated region fallthrough
CT: control target
= control target key end

     0   :  { %s1006_s0 = inlined_call_operand.vmem [shape: s32[32], index: 0, kind: input, shape index: {}]   ;;  %s1007_s1 = inlined_call_operand.vmem [shape: f32[50,32], index: 1, kind: input, shape index: {}]   ;;  %s1008_s2 = inlined_call_operand.vmem [shape: bf16[32,96], index: 2, kind: input, shape index: {}]   ;;  %s1009_s3 = inlined_call_operand.vmem [shape: f32[1,24], index: 3, kind: input, shape index: {}]   ;;  %s1010_s4 = inlined_call_operand.vmem [shape: bf16[24,5], index: 4, kind: input, shape index: {}]   ;;  %s1011_s5 = inlined_call_operand.vmem [shape: f32[1,5], index: 5, kind: input, shape index: {}]   ;;  %s1012_s6 = inlined_call_operand.hbm [shape: f32[2,1,5], index: 6, kind: output, shape index: {}]  }
   0x1   :  { %1014 = sst [smem:[#allocation11_spill]] %s1008_s2  ;;  %s11_s23 = sshll.u32 %s1006_s0, 4  ;;  %s12_s23 = int_to_ptr.vmem [resolvable:$true] %s11_s23 }
   0x2   :  { %s673_s24 = scalar_lea.vmem %s12_s23, 16  ;;  %p678_p1 = scmp.lt.s32.totalorder %s12_s23, %s12_s23 }
   0x3   :  { %p674_p0 = scmp.ne.s32.totalorder %s12_s23, %s673_s24  ;;  %p679_p2 = scmp.lt.s32.totalorder %s673_s24, %s673_s24 }
   0x5   :  { %p680_p3 = por %p679_p2, %p678_p1 }
   0x7   :  { %p681_p4 = pnand %p680_p3, %p674_p0 }
   0x9   :  { %684 = shalt.err (!%p681_p4)  }
   0xa   :  { %s751_s25 = smov [#allocation4]  }
   0xb   :  { %14 = dma.vmem_to_smem %s12_s23, 16, %s751_s25, [#allocation3] }
   0xc   :  { %729 = dma.done.wait [#allocation3], 16 }
   0xd   :  { %730 = vsyncadd [#allocation3], 4294967280 }
   0xe   :  { %16 = sfence }
   0xf   :  { %17 = vsyncpa [#allocation6], 0 }
  0x10   :  { %19 = vsyncpa [#allocation6 + $0x1], 0  ;;  %s798_s26 = smov 0   ;;  %s800_s27 = smov 0  }
  0x11   :  { %s802_s0 = smov 0   ;;  %s804_s28 = smov 0  }
  0x12 LB: > { %1015 = sst [smem:[#allocation9_spill]] %s745_s0  ;;  %s586_s29 = sadd.s32 4294967295, %s749_s28   ;;  %s749_s28 = sphi %s804_s28, %s1024_s28   ;;  %s745_s0 = sphi %s802_s0, %s1021_s0   ;;  %s741_s27 = sphi %s800_s27, %s1023_s27   ;;  %s737_s26 = sphi %s798_s26, %s1022_s26  }
  0x13   : > { %s587_s30 = sadd.s32 4294967294, %s749_s28   ;;  %s821_s7 = sadd.s32 1, %s749_s28  }
  0x14   : > { %s137_s8 = sadd.s32 1, %s745_s0  ;;  %s134_s9 = ssub.s32 %s749_s28, %s821_s7 }
  0x15   : > { %p147_p5 = scmp.ne.s32.totalorder %s745_s0, %s741_s27  ;;  %p135_p6 = scmp.eq.s32.totalorder %s134_s9, 0 }
  0x16   : > { %p148_p7 = scmp.eq.s32.totalorder %s586_s29, 1  ;;  %p153_p8 = scmp.ne.s32.totalorder %s741_s27, %s737_s26 }
  0x17   : > { %p154_p9 = scmp.eq.s32.totalorder %s587_s30, 1  ;;  %p589_p12 = scmp.ge.s32.totalorder %s749_s28, 1 }
  0x18   : > { %s831_s10 = scalar_select %p135_p6, %s745_s0, %s137_s8  }
  0x19   : > { %p833_p10 = por %p148_p7, %p147_p5  ;;  %p837_p11 = por %p154_p9, %p153_p8 }
  0x1a   : > { %1016 = sst [smem:[#allocation10_spill]] %s831_s10  ;;  %p187_p13 = scmp.lt.s32.totalorder %s749_s28, 3 }
  0x1c   : > { %p188_p0 = pnand %p589_p12, %p187_p13 }
  0x1d   : > { %s1019_s2 = sld [smem:[#allocation11_spill]] (!%p188_p0)  ;;  %v752_v1 = vmov (!%p188_p0), 0.0   ;;  %vm753_vm0 = vmmov (!%p188_p0), 0   ;;  %s852_s17 = sshll.u32 (!%p188_p0), %s586_s29, 4  ;;  %vm214_vm1 = vcmask (!%p188_p0), 253952   ;;  %vm310_vm2 = vcmask (!%p188_p0), 261120  }
  0x1e   : > { %191 = sbr.rel (%p188_p0) target bundleno = 779 (0x30b), region = 40  ;;  %606 = vmatprep.subr.bf16.mxu0 (!%p188_p0), %v752_v1  ;;  %614 = vmatprep.subr.bf16.mxu1 (!%p188_p0), %v752_v1  ;;  %s211_s18 = sld [smem:[#allocation4 + %s852_s17]] (!%p188_p0)  ;;  %vm357_vm3 = vcmask (!%p188_p0), 1046528   ;;  %vm369_vm4 = vcmask (!%p188_p0), 1045504   ;;  %vm392_vm5 = vcmask (!%p188_p0), 1044480   ;;  %vm415_vm6 = vcmask (!%p188_p0), 1043456  }
  0x1f   : > { %610 = vmatprep.mubr.msk.bf16.mxu0 (!%p188_p0), %vm753_vm0, %v752_v1  ;;  %s216_s19 = sadd.s32 (!%p188_p0), 1, %s852_s17  ;;  %618 = vmatprep.mubr.msk.bf16.mxu1 (!%p188_p0), %vm753_vm0, %v752_v1  ;;  %s221_s21 = sadd.s32 (!%p188_p0), 2, %s852_s17  ;;  %vm381_vm7 = vcmask (!%p188_p0), 64512   ;;  %vm383_vm8 = vcmask (!%p188_p0), 62464   ;;  %vm406_vm9 = vcmask (!%p188_p0), 258240   ;;  %vm404_vm10 = vcmask (!%p188_p0), 261312  }
  0x20   : > { %s217_s20 = sld [smem:[#allocation4 + %s216_s19]] (!%p188_p0)  ;;  %s226_s23 = sadd.s32 (!%p188_p0), 3, %s852_s17  ;;  %vm429_vm11 = vcmask (!%p188_p0), 519616   ;;  %vm427_vm12 = vcmask (!%p188_p0), 523712   ;;  %vm447_vm13 = vcmask (!%p188_p0), 130048   ;;  %vm466_vm14 = vcmask (!%p188_p0), 195584  }
  0x21   : > { %s222_s22 = sld [smem:[#allocation4 + %s221_s21]] (!%p188_p0)  ;;  %s231_s25 = sadd.s32 (!%p188_p0), 4, %s852_s17  ;;  %vm513_vm15 = vcmask (!%p188_p0), 32768  }
  0x22   : > { %s227_s24 = sld [smem:[#allocation4 + %s226_s23]] (!%p188_p0)  ;;  %s236_s30 = sadd.s32 (!%p188_p0), 5, %s852_s17 }
  0x23   : > { %v669_v0 = vld [vmem:[%s1019_s2] sm:$0xff] (!%p188_p0)   ;;  %v670_v2 = vld [vmem:[%s1019_s2 + $0x8] sm:$0xff] (!%p188_p0)   ;;  %s232_s29 = sld [smem:[#allocation4 + %s231_s25]] (!%p188_p0)  ;;  %s241_s9 = sadd.s32 (!%p188_p0), 6, %s852_s17 }
  0x24   : > { %607 = vmatpush3.bf16.msra.mxu0 (!%p188_p0), %v669_v0  ;;  %s237_s8 = sld [smem:[#allocation4 + %s236_s30]] (!%p188_p0)  ;;  %s212_s15 = scalar_lea.vmem (!%p188_p0), %s1007_s1, %s211_s18  ;;  %v671_v0 = vld [vmem:[%s1010_s4] sm:$0xff] (!%p188_p0)  }
  0x25   : > { %608 = vmatprep.subr.bf16.mxu0 %v752_v1  ;;  %s242_s16 = sld [smem:[#allocation4 + %s241_s9]]  ;;  %v213_v3 = vld [vmem:[%s212_s15] sm:$0x1]  ;;  %s246_s10 = sadd.s32 7, %s852_s17  ;;  %615 = vmatpush3.bf16.msra.mxu1 %v671_v0 }
  0x26   : > { %s218_s21 = scalar_lea.vmem %s1007_s1, %s217_s20  ;;  %215 = vst.msk [vmem:[#allocation2] sm:$0x1] %vm214_vm1, %v213_v3  ;;  %s247_s0 = sld [smem:[#allocation4 + %s246_s10]]  ;;  %616 = vmatprep.subr.bf16.mxu1 %v752_v1 }
  0x27   : > { %v219_v4 = vld [vmem:[%s218_s21] sm:$0x1]  ;;  %s223_s30 = scalar_lea.vmem %s1007_s1, %s222_s22  ;;  %s251_s2 = sadd.s32 8, %s852_s17 }
  0x28   : > { %609 = vmatpush3.bf16.msra.mxu0 %v670_v2  ;;  %220 = vst.msk [vmem:[#allocation2 + $0x1] sm:$0x1] %vm214_vm1, %v219_v4  ;;  %v224_v5 = vld [vmem:[%s223_s30] sm:$0x1]  ;;  %s228_s13 = scalar_lea.vmem %s1007_s1, %s227_s24  ;;  %s252_s19 = sld [smem:[#allocation4 + %s251_s2]] }
  0x29   : > { %225 = vst.msk [vmem:[#allocation2 + $0x2] sm:$0x1] %vm214_vm1, %v224_v5  ;;  %v229_v6 = vld [vmem:[%s228_s13] sm:$0x1]  ;;  %s233_s15 = scalar_lea.vmem %s1007_s1, %s232_s29  ;;  %s256_s24 = sadd.s32 9, %s852_s17 }
  0x2a   : > { %230 = vst.msk [vmem:[#allocation2 + $0x3] sm:$0x1] %vm214_vm1, %v229_v6  ;;  %v234_v7 = vld [vmem:[%s233_s15] sm:$0x1]  ;;  %s238_s21 = scalar_lea.vmem %s1007_s1, %s237_s8  ;;  %s257_s18 = sld [smem:[#allocation4 + %s256_s24]] }
  0x2b   : > { %235 = vst.msk [vmem:[#allocation2 + $0x4] sm:$0x1] %vm214_vm1, %v234_v7  ;;  %v239_v8 = vld [vmem:[%s238_s21] sm:$0x1]  ;;  %s243_s30 = scalar_lea.vmem %s1007_s1, %s242_s16  ;;  %s261_s29 = sadd.s32 10, %s852_s17 }
  0x2c   : > { %240 = vst.msk [vmem:[#allocation2 + $0x5] sm:$0x1] %vm214_vm1, %v239_v8  ;;  %v244_v9 = vld [vmem:[%s243_s30] sm:$0x1]  ;;  %s266_s9 = sadd.s32 11, %s852_s17  ;;  %s248_s2 = scalar_lea.vmem %s1007_s1, %s247_s0 }
  0x2d   : > { %245 = vst.msk [vmem:[#allocation2 + $0x6] sm:$0x1] %vm214_vm1, %v244_v9  ;;  %s262_s20 = sld [smem:[#allocation4 + %s261_s29]]  ;;  %v249_v10 = vld [vmem:[%s248_s2] sm:$0x1]  ;;  %s271_s15 = sadd.s32 12, %s852_s17 }
  0x2e   : > { %s267_s14 = sld [smem:[#allocation4 + %s266_s9]]  ;;  %250 = vst.msk [vmem:[#allocation2 + $0x7] sm:$0x1] %vm214_vm1, %v249_v10  ;;  %s253_s22 = scalar_lea.vmem %s1007_s1, %s252_s19  ;;  %v672_v4 = vld [vmem:[%s1010_s4 + $0x8] ss:$0 sps:$4 sm:$0xff]  }
  0x2f   : > { %s272_s21 = sld [smem:[#allocation4 + %s271_s15]]  ;;  %v254_v11 = vld [vmem:[%s253_s22] sm:$0x1]  ;;  %s276_s24 = sadd.s32 13, %s852_s17  ;;  %v471_v7 = vsel %vm415_vm6, %v672_v4, 0 }
  0x30   : > { %s281_s23 = sadd.s32 14, %s852_s17  ;;  %255 = vst.msk [vmem:[#allocation2 + $0x8] sm:$0x1] %vm214_vm1, %v254_v11  ;;  %s258_s0 = scalar_lea.vmem %s1007_s1, %s257_s18  ;;  %617 = vmatpush3.bf16.msra.mxu1 %v471_v7 }
  0x31   : > { %s277_s29 = sld [smem:[#allocation4 + %s276_s24]]  ;;  %v259_v12 = vld [vmem:[%s258_s0] sm:$0x1]  ;;  %s286_s13 = sadd.s32 15, %s852_s17 }
  0x32   : > { %s282_s9 = sld [smem:[#allocation4 + %s281_s23]]  ;;  %260 = vst.msk [vmem:[#allocation2 + $0x9] sm:$0x1] %vm214_vm1, %v259_v12  ;;  %s758_s24 = smov 88  }
  0x33   : > { %s263_s19 = scalar_lea.vmem %s1007_s1, %s262_s20  ;;  %s287_s15 = sld [smem:[#allocation4 + %s286_s13]] }
  0x34   : > { %v264_v13 = vld [vmem:[%s263_s19] sm:$0x1]  ;;  %s268_s22 = scalar_lea.vmem %s1007_s1, %s267_s14  ;;  %s756_s19 = smov 104  }
  0x35   : > { %265 = vst.msk [vmem:[#allocation2 + $0xa] sm:$0x1] %vm214_vm1, %v264_v13  ;;  %v269_v14 = vld [vmem:[%s268_s22] sm:$0x1]  ;;  %s273_s23 = scalar_lea.vmem %s1007_s1, %s272_s21  ;;  %s207_s20 = sand.u32 1, %s741_s27  }
  0x36   : > { %270 = vst.msk [vmem:[#allocation2 + $0xb] sm:$0x1] %vm214_vm1, %v269_v14  ;;  %v274_v15 = vld [vmem:[%s273_s23] sm:$0x1]  ;;  %s208_s13 = scalar_lea.vmem [#allocation5], %s207_s20 }
  0x37   : > { %275 = vst.msk [vmem:[#allocation2 + $0xc] sm:$0x1] %vm214_vm1, %v274_v15  ;;  %s278_s30 = scalar_lea.vmem %s1007_s1, %s277_s29  ;;  %v291_v19 = vld [vmem:[#allocation2] sm:$0xff]  ;;  %s754_s29 = smov 112  }
  0x38   : > { %v279_v16 = vld [vmem:[%s278_s30] sm:$0x1]  ;;  %s283_s14 = scalar_lea.vmem %s1007_s1, %s282_s9  ;;  %s755_s9 = smov 120  }
  0x39   : > { %280 = vst.msk [vmem:[#allocation2 + $0xd] sm:$0x1] %vm214_vm1, %v279_v16  ;;  %v284_v17 = vld [vmem:[%s283_s14] sm:$0x1]  ;;  %s288_s21 = scalar_lea.vmem %s1007_s1, %s287_s15  ;;  %s757_s15 = smov 96  }
  0x3a   : > { %285 = vst.msk [vmem:[#allocation2 + $0xe] sm:$0x1] %vm214_vm1, %v284_v17  ;;  %v289_v18 = vld [vmem:[%s288_s21] sm:$0x1]  ;;  %s528_s14 = sshll.u32 %s208_s13, 4  ;;  %s964_s21 = scalar_lea.hbm %s1012_s6, %s852_s17  ;;  %s966_s14 = int_to_ptr.vmem [resolvable:$true] %s528_s14 }
  0x3b   : > { %290 = vst.msk [vmem:[#allocation2 + $0xf] sm:$0x1] %vm214_vm1, %v289_v18 }
  0x42   : > { %v292_v20 = vld [vmem:[#allocation2 + $0x8] sm:$0xff] }
  0x43   : > { %v293_v21 = vpack.c.bf16 %v292_v20, %v291_v19 }
  0x45   : > { %611 = vmatmul.mubr.msk.bf16.vlgmr.msra.gmra.mrb[0].mxu0 %vm310_vm2, %v293_v21 }
 0x118   : > { %v348_v22 = vpop.f32.mrb[0].mxu0 }
 0x119   : > { %v612_v23 = vpop.f32.mrb[1].mxu0  ;;  %v358_v25 = vrot.slane %v348_v22, 1  ;;  %v370_v26 = vrot.slane %v348_v22, 2  ;;  %v393_v27 = vrot.slane %v348_v22, 3  ;;  %v416_v33 = vrot.slane %v348_v22, 4 }
 0x11a   : > { %v351_v24 = vpop.f32.mrb[2].mxu0 }
 0x11b   : > { %v613_v28 = vpop.f32.mrb[3].mxu0  ;;  %v371_v29 = vrot.slane %v351_v24, 2  ;;  %v359_v30 = vrot.slane %v351_v24, 1  ;;  %v394_v31 = vrot.slane %v351_v24, 3  ;;  %v417_v32 = vrot.slane %v351_v24, 4 }
 0x11c   : > { %v456_v28 = vld [vmem:[%s1011_s5] sm:$0x1] }
 0x11d   : > { %375 = vrot.lane.b32.xlu1 %v371_v29, %s754_s29  ;;  %363 = vrot.lane.b32.xlu0 %v359_v30, %s755_s9  ;;  %v360_v34 = vsel %vm357_vm3, %v358_v25, %v359_v30  ;;  %v372_v35 = vsel %vm369_vm4, %v370_v26, %v371_v29  ;;  %v395_v36 = vsel %vm392_vm5, %v393_v27, %v394_v31 }
 0x11e   : > { %v418_v37 = vsel %vm415_vm6, %v416_v33, %v417_v32 }
 0x121   : > { %398 = vrot.lane.b32.xlu1 %v394_v31, %s756_s19  ;;  %361 = vrot.lane.b32.xlu0 %v360_v34, %s755_s9  ;;  %s685_s9 = scalar_lea.vmem %s966_s14, 16 }
 0x122   : > { %p686_p1 = scmp.ne.s32.totalorder %s966_s14, %s685_s9 }
 0x124   : > { %p687_p2 = pnand %p686_p1, %p833_p10 }
 0x125   : > { %373 = vrot.lane.b32.xlu1 %v372_v35, %s754_s29  ;;  %396 = vrot.lane.b32.xlu0 %v395_v36, %s756_s19  ;;  %s759_s19 = smov [#allocation5]  }
 0x126   : > { %p688_p3 = pneg %p687_p2 }
 0x129   : > { %421 = vrot.lane.b32.xlu1 %v417_v32, %s757_s15  ;;  %419 = vrot.lane.b32.xlu0 %v418_v37, %s757_s15  ;;  %s689_s15 = sshll.u32 %s759_s19, 4  ;;  %s690_s15 = int_to_ptr.vmem [resolvable:$false] %s689_s15 }
 0x12a   : > { %s691_s16 = scalar_lea.vmem %s690_s15, 32  ;;  %p692_p4 = scmp.lt.s32.totalorder %s966_s14, %s690_s15 }
 0x12b   : > { %p693_p5 = scmp.lt.s32.totalorder %s691_s16, %s685_s9 }
 0x12d   : > { %p694_p6 = por %p693_p5, %p692_p4 }
 0x12f   : > { %p695_p7 = pnand %p694_p6, %p688_p3 }
 0x18f   : > { %v376_v38 = vpop.permute.xlu1 %375  ;;  %v364_v39 = vpop.permute.xlu0 %363 }
 0x190   : > { %v368_v40 = vadd.f32 %v364_v39, %v351_v24 }
 0x192   : > { %v380_v43 = vadd.f32 %v376_v38, %v368_v40 }
 0x193   : > { %v399_v41 = vpop.permute.xlu1 %398  ;;  %v362_v42 = vpop.permute.xlu0 %361 }
 0x194   : > { %v367_v44 = vadd.f32 %v362_v42, %v348_v22  ;;  %v403_v47 = vadd.f32 %v399_v41, %v380_v43  ;;  %v384_v50 = vsel %vm383_vm8, %v380_v43, -inf  ;;  %v449_v22 = vld [vmem:[%s1009_s3] sm:$0x1] }
 0x196   : > { %v407_v55 = vsel %vm406_vm9, %v403_v47, -inf }
 0x197   : > { %v374_v45 = vpop.permute.xlu1 %373  ;;  %v397_v46 = vpop.permute.xlu0 %396 }
 0x198   : > { %v379_v48 = vadd.f32 %v374_v45, %v367_v44 }
 0x19a   : > { %v382_v49 = vsel %vm381_vm7, %v379_v48, -inf  ;;  %v402_v51 = vadd.f32 %v397_v46, %v379_v48 }
 0x19b   : > { %v385_v52 = vmax.f32 %v382_v49, %v384_v50  ;;  %v422_v53 = vpop.permute.xlu1 %421  ;;  %v420_v54 = vpop.permute.xlu0 %419 }
 0x19c   : > { %v405_v56 = vsel %vm404_vm10, %v402_v51, -inf  ;;  %v426_v57 = vadd.f32 %v422_v53, %v403_v47  ;;  %v425_v58 = vadd.f32 %v420_v54, %v402_v51 }
 0x19d   : > { %v408_v59 = vmax.f32 %v405_v56, %v407_v55  ;;  %v386_v1 = vrot.slane %v385_v52, 4 }
 0x19e   : > { %v430_v60 = vsel %vm429_vm11, %v426_v57, -inf  ;;  %v428_v61 = vsel %vm427_vm12, %v425_v58, -inf }
 0x19f   : > { %v409_v62 = vrot.slane %v408_v59, 4  ;;  %v431_v63 = vmax.f32 %v428_v61, %v430_v60  ;;  %v387_v15 = vmax.f32 %v385_v52, %v386_v1 }
 0x1a1   : > { %v410_v2 = vmax.f32 %v408_v59, %v409_v62  ;;  %v432_v3 = vrot.slane %v431_v63, 4  ;;  %v388_v16 = vrot.slane %v387_v15, 2 }
 0x1a3   : > { %v411_v5 = vrot.slane %v410_v2, 2  ;;  %v433_v6 = vmax.f32 %v431_v63, %v432_v3  ;;  %v389_v17 = vmax.f32 %v387_v15, %v388_v16 }
 0x1a5   : > { %v434_v8 = vrot.slane %v433_v6, 2  ;;  %v412_v9 = vmax.f32 %v410_v2, %v411_v5  ;;  %v390_v18 = vrot.slane %v389_v17, 1 }
 0x1a7   : > { %v413_v10 = vrot.slane %v412_v9, 1  ;;  %v435_v11 = vmax.f32 %v433_v6, %v434_v8  ;;  %v391_v19 = vmax.f32 %v389_v17, %v390_v18 }
 0x1a9   : > { %v414_v12 = vmax.f32 %v412_v9, %v413_v10  ;;  %v436_v13 = vrot.slane %v435_v11, 1 }
 0x1ab   : > { %439 = vrot.lane.b32.xlu0 %v414_v12, %s754_s29  ;;  %v437_v14 = vmax.f32 %v435_v11, %v436_v13  ;;  %s516_s29 = scalar_lea.sflag [#allocation6], %s207_s20 }
 0x1ad   : > { %443 = vrot.lane.b32.xlu1 %v437_v14, %s758_s24 }
 0x21d   : > { %v440_v20 = vpop.permute.xlu0 %439 }
 0x21e   : > { %v446_v21 = vsel %vm381_vm7, %v391_v19, %v440_v20 }
 0x21f   : > { %v444_v23 = vpop.permute.xlu1 %443 }
 0x220   : > { %v448_v24 = vsel %vm447_vm13, %v446_v21, %v444_v23 }
 0x221   : > { %v450_v25 = vadd.f32 %v449_v22, %v448_v24 }
 0x223   : > { %v451_v26 = vmax.f32 %v450_v25, 0.0 }
 0x225   : > { %v452_v27 = vpack.c.bf16 %v451_v26, %v451_v26 }
 0x227   : > { %619 = vmatmul.mubr.msk.bf16.vlgmr.msra.gmra.mrb[0].mxu1 %vm466_vm14, %v452_v27 }
 0x2fa   : > { %v507_v29 = vpop.f32.mrb[0].mxu1 }
 0x2fb   : > { %v508_v30 = vadd.f32 %v507_v29, %v456_v28  ;;  %v620_v31 = vpop.f32.mrb[1].mxu1 }
 0x2fc   : > { %v510_v32 = vpop.f32.mrb[2].mxu1 }
 0x2fd   : > { %v621_v33 = vpop.f32.mrb[3].mxu1  ;;  %514 = vst.msk [vmem:[%s208_s13] sm:$0x1] %vm513_vm15, %v508_v30 }
 0x2fe   : > { %698 = shalt.err (!%p695_p7)
}
 0x2ff   : > { %s699_s17 = scalar_lea.hbm %s964_s21, 16  ;;  %s703_s18 = scalar_lea.hbm %s1012_s6, 32 }
 0x300   : > { %p700_p8 = scmp.ne.s32.totalorder %s964_s21, %s699_s17  ;;  %p704_p13 = scmp.lt.u32.totalorder %s964_s21, %s1012_s6 }
 0x301   : > { %p705_p0 = scmp.lt.u32.totalorder %s703_s18, %s699_s17  ;;  %p707_p2 = scmp.lt.u32.totalorder %s699_s17, %s964_s21 }
 0x302   : > { %p701_p9 = pnand %p700_p8, %p833_p10 }
 0x303   : > { %p706_p1 = por %p705_p0, %p704_p13 }
 0x304   : > { %p702_p12 = pneg %p701_p9 }
 0x305   : > { %p708_p3 = por %p707_p2, %p706_p1 }
 0x307   : > { %p709_p4 = pnand %p708_p3, %p702_p12 }
 0x309   : > { %712 = shalt.err (!%p709_p4)
}
 0x30a   : > { %622 = dma.vmem_to_hbm [thread:$0]  (%p833_p10), %s966_s14, 16, %s964_s21, %s516_s29  }
 0x30b PF: > { %p628_p5 = scmp.ge.s32.totalorder %s749_s28, 2  ;;  %s540_s25 = sand.u32 1, %s737_s26  }
 0x30c   : > { %s541_s20 = scalar_lea.sflag [#allocation6], %s540_s25 }
 0x30d   : > { %p625_p6 = pnand %p628_p5, %p837_p11 }
 0x30f   : > { %732 = dma.done.wait (!%p625_p6), %s541_s20, 16  }
 0x310   : > { %734 = vsyncadd (!%p625_p6), %s541_s20, 4294967280  ;;  %s1020_s30 = sld [smem:[#allocation9_spill]]  ;;  %s1021_s0 = sld [smem:[#allocation10_spill]] }
 0x311   : > { %p22_p7 = scmp.ge.s32.totalorder %s821_s7, 4   ;;  %s1022_s26 = smov %s741_s27 }
 0x312   : > { %s1024_s28 = smov %s821_s7 }
 0x313   :  { %24 = sbr.rel (!%p22_p7) target bundleno = 18 (0x12), region = 88 }
 0x316   : > { %s1023_s27 = smov %s1020_s30 }
 0x31a   :  { %545 = vsyncpa [#allocation6], 1 }
 0x31b   :  { %547 = vsyncpa [#allocation6 + $0x1], 1 }

</bundles_post_ra>
